<compile_context>
chip_gen: v6e
topology: v6e:2x2x1
jax: 0.10.0
libtpu: 0.0.40
codegen_flags: <defaults>
</compile_context>

<pallas_src>
import jax
import jax.numpy as jnp
from jax.experimental import pallas as pl
from jax.experimental.pallas import tpu as pltpu

NUM_GROUPS = 8
EPS = 1e-5  # PyTorch GroupNorm default


# ----------------------------------------------------------------------------
# Simple (single-pass) path: whole (Nb, Gb) batch of group slabs per grid step.
# ----------------------------------------------------------------------------
def _group_norm_kernel(x_ref, gamma_ref, beta_ref, o_ref):
    # x_ref / o_ref : (Nb, Gb, R, L)   batched (sample, group) slabs
    # gamma_ref     : (Gb, R, 1)       per-row affine weight (row = channel slice)
    # beta_ref      : (Gb, R, 1)
    _, _, r, l = x_ref.shape
    inv_count = 1.0 / float(r * l)

    x = x_ref[...]  # native dtype

    # Single-pass sum / sum-of-squares with f32 accumulation.  The upcasts feed
    # straight into the lane (XLU) reductions, so no named full-block f32 copy
    # is kept live across passes (matters for bf16 inputs on v7x's 64 MiB VMEM).
    s = jnp.sum(x.astype(jnp.float32), axis=-1, keepdims=True)              # (Nb,Gb,R,1)
    sq = jnp.sum(jnp.square(x.astype(jnp.float32)), axis=-1, keepdims=True)  # (Nb,Gb,R,1)

    mean = jnp.sum(s, axis=2, keepdims=True) * inv_count                    # (Nb,Gb,1,1)
    mean_sq = jnp.sum(sq, axis=2, keepdims=True) * inv_count
    # Clamp: E[x^2] - E[x]^2 can round slightly negative -> NaN from rsqrt.
    var = jnp.maximum(mean_sq - mean * mean, 0.0)
    inv = jax.lax.rsqrt(var + EPS)

    gamma = gamma_ref[...].astype(jnp.float32)[None]                        # (1,Gb,R,1)
    beta = beta_ref[...].astype(jnp.float32)[None]
    a = gamma * inv                                                         # (Nb,Gb,R,1)
    b = beta - mean * a

    if o_ref.dtype == jnp.float32:
        o_ref[...] = x.astype(jnp.float32) * a + b
    else:
        # Keep the big-tensor pass in the native dtype (no f32 block temp).
        o_ref[...] = (x * a.astype(x.dtype) + b.astype(x.dtype)).astype(o_ref.dtype)


# ----------------------------------------------------------------------------
# Tiled (two-pass) fallback for slabs larger than the per-block VMEM budget.
# ----------------------------------------------------------------------------
def _stats_kernel(x_ref, s_ref, sq_ref, s_acc, sq_acc):
    # x_ref: (1, Rt, 128) row tile of one (sample, group) slab
    # s_ref / sq_ref: (1, 1, 1) per-slab sum / sum-of-squares outputs
    t = pl.program_id(1)

    @pl.when(t == 0)
    def _():
        s_acc[...] = jnp.zeros_like(s_acc)
        sq_acc[...] = jnp.zeros_like(sq_acc)

    xf = x_ref[0].astype(jnp.float32)                    # (Rt, 128)
    s_acc[...] += jnp.sum(xf, keepdims=True)             # (1, 1)
    sq_acc[...] += jnp.sum(xf * xf, keepdims=True)

    @pl.when(t == pl.num_programs(1) - 1)
    def _():
        s_ref[0] = s_acc[...]
        sq_ref[0] = sq_acc[...]


def _apply_kernel(x_ref, a_ref, b_ref, o_ref):
    # x_ref/o_ref: (1, Rt, 128); a_ref/b_ref: (1, Rt, 1) fused per-row affine.
    x = x_ref[0]
    a = a_ref[0]
    b = b_ref[0]
    if o_ref.dtype == jnp.float32:
        o_ref[0] = x.astype(jnp.float32) * a + b
    else:
        o_ref[0] = (x * a.astype(x.dtype) + b.astype(x.dtype)).astype(o_ref.dtype)


# ----------------------------------------------------------------------------
# Wrapper-side sizing helpers.
# ----------------------------------------------------------------------------
def _vmem_limit_bytes():
    """Generation-aware scoped-VMEM budget (falls back to a safe 32 MiB)."""
    try:
        cap = getattr(pltpu.get_tpu_info(), "vmem_capacity_bytes", None)
        if cap:
            return max(32 * 1024 * 1024, min(int(cap * 0.6), 112 * 1024 * 1024))
    except Exception:
        pass
    return 32 * 1024 * 1024


def _largest_divisor_leq(n, cap):
    best = 1
    d = 1
    while d * d <= n:
        if n % d == 0:
            if d <= cap:
                best = max(best, d)
            q = n // d
            if q <= cap:
                best = max(best, q)
        d += 1
    return best


def _choose_row_tile(rows, rt_max, sub):
    """Largest divisor of `rows` that is a multiple of `sub` and <= rt_max."""
    best = None
    upper = min(rows, rt_max)
    for d in range(sub, upper + 1, sub):
        if rows % d == 0:
            best = d
    return best


def _group_norm_tiled(x, g_rows, b_rows, N, G, R, Rt, vmem_limit):
    """Two-pass HW-tiled path: stats sweep then normalize sweep."""
    NG = N * G
    x_flat = x.reshape(NG, R, 128)
    count = float(R * 128)

    s, sq = pl.pallas_call(
        _stats_kernel,
        out_shape=(jax.ShapeDtypeStruct((NG, 1, 1), jnp.float32),
                   jax.ShapeDtypeStruct((NG, 1, 1), jnp.float32)),
        grid_spec=pltpu.PrefetchScalarGridSpec(
            num_scalar_prefetch=0,
            grid=(NG, R // Rt),
            in_specs=[pl.BlockSpec((1, Rt, 128), lambda i, t: (i, t, 0))],
            out_specs=(pl.BlockSpec((1, 1, 1), lambda i, t: (i, 0, 0)),
                       pl.BlockSpec((1, 1, 1), lambda i, t: (i, 0, 0))),
            scratch_shapes=[pltpu.VMEM((1, 1), jnp.float32),
                            pltpu.VMEM((1, 1), jnp.float32)],
        ),
        compiler_params=pltpu.CompilerParams(
            dimension_semantics=("parallel", "arbitrary"),
            vmem_limit_bytes=vmem_limit,
        ),
    )(x_flat)

    # Tiny per-(sample, group) statistics + fused per-row affine coefficients.
    mean = s.reshape(N, G, 1, 1) / count
    var = jnp.maximum(sq.reshape(N, G, 1, 1) / count - mean * mean, 0.0)
    inv = jax.lax.rsqrt(var + EPS)
    a4 = g_rows[None].astype(jnp.float32) * inv                   # (N, G, R, 1)
    b4 = b_rows[None].astype(jnp.float32) - mean * a4
    a_flat = a4.reshape(NG, R, 1)
    b_flat = b4.reshape(NG, R, 1)

    out = pl.pallas_call(
        _apply_kernel,
        out_shape=jax.ShapeDtypeStruct((NG, R, 128), x.dtype),
        grid_spec=pltpu.PrefetchScalarGridSpec(
            num_scalar_prefetch=0,
            grid=(NG, R // Rt),
            in_specs=[
                pl.BlockSpec((1, Rt, 128), lambda i, t: (i, t, 0)),
                pl.BlockSpec((1, Rt, 1), lambda i, t: (i, t, 0)),
                pl.BlockSpec((1, Rt, 1), lambda i, t: (i, t, 0)),
            ],
            out_specs=pl.BlockSpec((1, Rt, 128), lambda i, t: (i, t, 0)),
        ),
        compiler_params=pltpu.CompilerParams(
            dimension_semantics=("parallel", "parallel"),
            vmem_limit_bytes=vmem_limit,
        ),
    )(x_flat, a_flat, b_flat)
    return out


# ----------------------------------------------------------------------------
# Public entry point.
# ----------------------------------------------------------------------------
def norm_layer_forward(x, gamma, beta, *, block_target_bytes=None):
    """GroupNorm(8, C) forward.  x: (N, C, H, W).  gamma, beta: (C,)."""
    N, C, H, W = x.shape
    G = NUM_GROUPS
    assert C % G == 0, "channels must be divisible by 8 groups"
    Cg = C // G
    HW = H * W
    itemsize = jnp.dtype(x.dtype).itemsize

    vmem_limit = _vmem_limit_bytes()
    if block_target_bytes is None:
        block_target_bytes = min(6 * 1024 * 1024, max(1024 * 1024, vmem_limit // 8))

    # Lane/sublane-dense row layout: (Cg, HW) -> (R, 128) when HW % 128 == 0,
    # with gamma/beta repeated per 128-wide row chunk (free row-major reshape).
    if HW % 128 == 0:
        rep = HW // 128
        R, L = Cg * rep, 128
        g_rows = jnp.repeat(gamma.reshape(G, Cg), rep, axis=1).reshape(G, R, 1)
        b_rows = jnp.repeat(beta.reshape(G, Cg), rep, axis=1).reshape(G, R, 1)
    else:
        R, L = Cg, HW
        g_rows = gamma.reshape(G, R, 1)
        b_rows = beta.reshape(G, R, 1)

    slab_bytes = Cg * HW * itemsize  # one (sample, group) slab

    # Large slabs: HW-tiled two-pass path keeps the per-block working set small
    # (needed for v7x's 64 MiB VMEM / 32 MiB scoped default).
    if slab_bytes > block_target_bytes and L == 128:
        sub = 8 * max(1, 4 // itemsize)          # sublane multiple (f32: 8, bf16: 16)
        rt_max = max(sub, block_target_bytes // (128 * itemsize))
        Rt = _choose_row_tile(R, rt_max, sub)
        if Rt is not None and Rt < R:
            out = _group_norm_tiled(x, g_rows, b_rows, N, G, R, Rt, vmem_limit)
            return out.reshape(N, C, H, W)
    # TODO(synk): huge slabs with HW % 128 != 0 (or with no even row tiling)
    # still take the single-slab path below and may exceed the VMEM budget.

    # Simple path: batch (sample, group) slabs per grid step so block bytes sit
    # in the ~1-6 MiB sweet spot instead of paying ~0.35us/step on tiny blocks.
    Gb = _largest_divisor_leq(G, max(1, block_target_bytes // max(1, slab_bytes)))
    Nb = 1
    if Gb == G:
        Nb = _largest_divisor_leq(N, max(1, block_target_bytes // max(1, G * slab_bytes)))

    x4 = x.reshape(N, G, R, L)
    out = pl.pallas_call(
        _group_norm_kernel,
        out_shape=jax.ShapeDtypeStruct((N, G, R, L), x.dtype),
        grid_spec=pltpu.PrefetchScalarGridSpec(
            num_scalar_prefetch=0,
            # Group axis outermost -> gamma/beta block index is constant across
            # all consecutive sample steps, so Pallas skips their re-DMA.
            grid=(G // Gb, N // Nb),
            in_specs=[
                pl.BlockSpec((Nb, Gb, R, L), lambda g, n: (n, g, 0, 0)),
                pl.BlockSpec((Gb, R, 1), lambda g, n: (g, 0, 0)),
                pl.BlockSpec((Gb, R, 1), lambda g, n: (g, 0, 0)),
            ],
            out_specs=pl.BlockSpec((Nb, Gb, R, L), lambda g, n: (n, g, 0, 0)),
        ),
        compiler_params=pltpu.CompilerParams(
            dimension_semantics=("parallel", "parallel"),
            vmem_limit_bytes=vmem_limit,
        ),
    )(x4, g_rows, b_rows)
    return out.reshape(N, C, H, W)


# ----------------------------------------------------------------------------
# Pure-JAX reference + self-test.
# ----------------------------------------------------------------------------
def _reference_group_norm(x, gamma, beta):
    N, C, H, W = x.shape
    G = NUM_GROUPS
    xg = x.reshape(N, G, C // G, H, W).astype(jnp.float32)
    mean = jnp.mean(xg, axis=(2, 3, 4), keepdims=True)
    var = jnp.mean((xg - mean) ** 2, axis=(2, 3, 4), keepdims=True)
    xn = ((xg - mean) / jnp.sqrt(var + EPS)).reshape(N, C, H, W)
    return xn * gamma.reshape(1, C, 1, 1) + beta.reshape(1, C, 1, 1)


if __name__ == "__main__":
    key = jax.random.PRNGKey(0)

    # 1) Default (simple batched) path.
    N, C, H, W = 2, 16, 16, 16          # channels divisible by 8 groups
    x = jax.random.normal(key, (N, C, H, W), dtype=jnp.float32)
    gamma = jnp.ones((C,), dtype=jnp.float32)
    beta = jnp.zeros((C,), dtype=jnp.float32)

    out = jax.block_until_ready(norm_layer_forward(x, gamma, beta))
    ref = _reference_group_norm(x, gamma, beta)
    assert out.shape == (N, C, H, W)
    assert jnp.max(jnp.abs(out - ref)) < 1e-4, "mismatch vs reference (simple path)"

    # 2) Exercise the HW-tiled two-pass fallback on a small shape by forcing a
    #    tiny per-block byte budget (same path large activations take on v7x).
    N2, C2, H2, W2 = 2, 16, 32, 32
    x2 = jax.random.normal(jax.random.PRNGKey(1), (N2, C2, H2, W2), dtype=jnp.float32)
    g2 = jax.random.normal(jax.random.PRNGKey(2), (C2,), dtype=jnp.float32)
    b2 = jax.random.normal(jax.random.PRNGKey(3), (C2,), dtype=jnp.float32)
    out2 = jax.block_until_ready(
        norm_layer_forward(x2, g2, b2, block_target_bytes=4096))
    ref2 = _reference_group_norm(x2, g2, b2)
    assert out2.shape == (N2, C2, H2, W2)
    assert jnp.max(jnp.abs(out2 - ref2)) < 1e-3, "mismatch vs reference (tiled path)"

    print("KERNEL_OK")
</pallas_src>

<mosaic_0001>
module attributes {stable_mosaic.version = 11 : i64} {
  func.func @_group_norm_kernel(%arg0: i32, %arg1: i32, %arg2: memref<2x8x4x128xf32, #tpu.memory_space<vmem>>, %arg3: memref<8x4x1xf32, #tpu.memory_space<vmem>>, %arg4: memref<8x4x1xf32, #tpu.memory_space<vmem>>, %arg5: memref<2x8x4x128xf32, #tpu.memory_space<vmem>>) attributes {dimension_semantics = [#tpu.dimension_semantics<parallel>, #tpu.dimension_semantics<parallel>], iteration_bounds = array<i64: 1, 1>, scalar_prefetch = 0 : i64, scratch_operands = 0 : i64, tpu.core_type = #tpu.core_type<tc>, window_params = [{transform_indices = @transform_0, window_bounds = array<i64: 2, 8, 4, 128>}, {transform_indices = @transform_1, window_bounds = array<i64: 8, 4, 1>}, {transform_indices = @transform_2, window_bounds = array<i64: 8, 4, 1>}, {transform_indices = @transform_3, window_bounds = array<i64: 2, 8, 4, 128>}]} {
    %c0 = arith.constant 0 : index
    %c0_0 = arith.constant 0 : index
    %c0_1 = arith.constant 0 : index
    %c0_2 = arith.constant 0 : index
    %0 = vector.load %arg2[%c0, %c0_0, %c0_1, %c0_2] : memref<2x8x4x128xf32, #tpu.memory_space<vmem>>, vector<2x8x4x128xf32>
    %cst = arith.constant dense<0.000000e+00> : vector<2x8x4xf32>
    %1 = vector.multi_reduction <add>, %0, %cst [3] : vector<2x8x4x128xf32> to vector<2x8x4xf32>
    %2 = vector.shape_cast %1 : vector<2x8x4xf32> to vector<2x8x4x1xf32>
    %3 = arith.mulf %0, %0 : vector<2x8x4x128xf32>
    %cst_3 = arith.constant dense<0.000000e+00> : vector<2x8x4xf32>
    %4 = vector.multi_reduction <add>, %3, %cst_3 [3] : vector<2x8x4x128xf32> to vector<2x8x4xf32>
    %5 = vector.shape_cast %4 : vector<2x8x4xf32> to vector<2x8x4x1xf32>
    %cst_4 = arith.constant dense<0.000000e+00> : vector<2x8x1xf32>
    %6 = vector.multi_reduction <add>, %2, %cst_4 [2] : vector<2x8x4x1xf32> to vector<2x8x1xf32>
    %7 = vector.shape_cast %6 : vector<2x8x1xf32> to vector<2x8x1x1xf32>
    %cst_5 = arith.constant 0.001953125 : f32
    %8 = vector.broadcast %cst_5 : f32 to vector<2x8x1x1xf32>
    %9 = arith.mulf %7, %8 : vector<2x8x1x1xf32>
    %cst_6 = arith.constant dense<0.000000e+00> : vector<2x8x1xf32>
    %10 = vector.multi_reduction <add>, %5, %cst_6 [2] : vector<2x8x4x1xf32> to vector<2x8x1xf32>
    %11 = vector.shape_cast %10 : vector<2x8x1xf32> to vector<2x8x1x1xf32>
    %cst_7 = arith.constant 0.001953125 : f32
    %12 = vector.broadcast %cst_7 : f32 to vector<2x8x1x1xf32>
    %13 = arith.mulf %11, %12 : vector<2x8x1x1xf32>
    %14 = arith.mulf %9, %9 : vector<2x8x1x1xf32>
    %15 = arith.subf %13, %14 : vector<2x8x1x1xf32>
    %cst_8 = arith.constant 0.000000e+00 : f32
    %16 = vector.broadcast %cst_8 : f32 to vector<2x8x1x1xf32>
    %17 = arith.maximumf %15, %16 : vector<2x8x1x1xf32>
    %cst_9 = arith.constant 9.99999974E-6 : f32
    %18 = vector.broadcast %cst_9 : f32 to vector<2x8x1x1xf32>
    %19 = arith.addf %17, %18 : vector<2x8x1x1xf32>
    %20 = math.rsqrt %19 : vector<2x8x1x1xf32>
    %c0_10 = arith.constant 0 : index
    %c0_11 = arith.constant 0 : index
    %c0_12 = arith.constant 0 : index
    %21 = vector.load %arg3[%c0_10, %c0_11, %c0_12] : memref<8x4x1xf32, #tpu.memory_space<vmem>>, vector<8x4x1xf32>
    %22 = vector.shape_cast %21 : vector<8x4x1xf32> to vector<1x8x4x1xf32>
    %c0_13 = arith.constant 0 : index
    %c0_14 = arith.constant 0 : index
    %c0_15 = arith.constant 0 : index
    %23 = vector.load %arg4[%c0_13, %c0_14, %c0_15] : memref<8x4x1xf32, #tpu.memory_space<vmem>>, vector<8x4x1xf32>
    %24 = vector.shape_cast %23 : vector<8x4x1xf32> to vector<1x8x4x1xf32>
    %25 = vector.broadcast %22 : vector<1x8x4x1xf32> to vector<2x8x4x1xf32>
    %26 = vector.broadcast %20 : vector<2x8x1x1xf32> to vector<2x8x4x1xf32>
    %27 = arith.mulf %25, %26 : vector<2x8x4x1xf32>
    %28 = vector.broadcast %9 : vector<2x8x1x1xf32> to vector<2x8x4x1xf32>
    %29 = arith.mulf %28, %27 : vector<2x8x4x1xf32>
    %30 = vector.broadcast %24 : vector<1x8x4x1xf32> to vector<2x8x4x1xf32>
    %31 = arith.subf %30, %29 : vector<2x8x4x1xf32>
    %32 = vector.broadcast %27 : vector<2x8x4x1xf32> to vector<2x8x4x128xf32>
    %33 = arith.mulf %0, %32 : vector<2x8x4x128xf32>
    %34 = vector.broadcast %31 : vector<2x8x4x1xf32> to vector<2x8x4x128xf32>
    %35 = arith.addf %33, %34 : vector<2x8x4x128xf32>
    %c0_16 = arith.constant 0 : index
    %c0_17 = arith.constant 0 : index
    %c0_18 = arith.constant 0 : index
    %c0_19 = arith.constant 0 : index
    %36 = vector.load %arg5[%c0_16, %c0_17, %c0_18, %c0_19] : memref<2x8x4x128xf32, #tpu.memory_space<vmem>>, vector<2x8x4x128xf32>
    tpu.vector_store %arg5[%c0_16, %c0_17, %c0_18, %c0_19], %35 {strides = array<i32>} : memref<2x8x4x128xf32, #tpu.memory_space<vmem>>, vector<2x8x4x128xf32>,
    return
  }
  func.func @transform_0(%arg0: i32, %arg1: i32) -> (i32, i32, i32, i32) {
    %c0_i32 = arith.constant 0 : i32
    %c0_i32_0 = arith.constant 0 : i32
    %c0_i32_1 = arith.constant 0 : i32
    return %arg1, %arg0, %c0_i32, %c0_i32_0 : i32, i32, i32, i32
  }
  func.func @transform_1(%arg0: i32, %arg1: i32) -> (i32, i32, i32) {
    %c0_i32 = arith.constant 0 : i32
    %c0_i32_0 = arith.constant 0 : i32
    %c0_i32_1 = arith.constant 0 : i32
    return %arg0, %c0_i32, %c0_i32_0 : i32, i32, i32
  }
  func.func @transform_2(%arg0: i32, %arg1: i32) -> (i32, i32, i32) {
    %c0_i32 = arith.constant 0 : i32
    %c0_i32_0 = arith.constant 0 : i32
    %c0_i32_1 = arith.constant 0 : i32
    return %arg0, %c0_i32, %c0_i32_0 : i32, i32, i32
  }
  func.func @transform_3(%arg0: i32, %arg1: i32) -> (i32, i32, i32, i32) {
    %c0_i32 = arith.constant 0 : i32
    %c0_i32_0 = arith.constant 0 : i32
    %c0_i32_1 = arith.constant 0 : i32
    return %arg1, %arg0, %c0_i32, %c0_i32_0 : i32, i32, i32, i32
  }
}

</mosaic_0001>

<bundles_post_ra>
// kernel: tpu_custom_call.1
= control target key start
LH: loop header
LB: loop body
LE: loop exit
PB: predicated region body
PF: predicated region fallthrough
CT: control target
= control target key end

     0   :  { %vm31_vm0 = vcmask 1043456   ;;  %s1245_s0 = inlined_call_operand.vmem [shape: f32[2,8,4,128], index: 0, kind: input, shape index: {}]   ;;  %s1246_s1 = inlined_call_operand.vmem [shape: f32[8,4,1], index: 1, kind: input, shape index: {}]   ;;  %s1247_s2 = inlined_call_operand.vmem [shape: f32[8,4,1], index: 2, kind: input, shape index: {}]   ;;  %s1248_s3 = inlined_call_operand.hbm [shape: f32[2,8,4,128], index: 3, kind: output, shape index: {}]  }
   0x1   :  { %v17_v0 = vld [vmem:[%s1245_s0 + $0x8] sm:$0xf]  ;;  %v15_v1 = vld [vmem:[%s1245_s0] sm:$0xf]  ;;  %v18_v4 = vld [vmem:[%s1245_s0 + $0xc] sm:$0xf] }
   0x2   :  { %v38_v2 = vsel %vm31_vm0, %v17_v0, 0.0  ;;  %v32_v3 = vsel %vm31_vm0, %v15_v1, 0.0  ;;  %v16_v5 = vld [vmem:[%s1245_s0 + $0x4] sm:$0xf]  ;;  %v41_v6 = vsel %vm31_vm0, %v18_v4, 0.0 }
   0x3   :  { %39 = vadd.xlane.f32.xlu1 %v38_v2  ;;  %33 = vadd.xlane.f32.xlu0 %v32_v3  ;;  %v35_v7 = vsel %vm31_vm0, %v16_v5, 0.0  ;;  %v20_v8 = vld [vmem:[%s1245_s0 + $0x14] sm:$0xf]  ;;  %v19_v9 = vld [vmem:[%s1245_s0 + $0x10] sm:$0xf] }
   0x4   :  { %v47_v10 = vsel %vm31_vm0, %v20_v8, 0.0  ;;  %v44_v11 = vsel %vm31_vm0, %v19_v9, 0.0  ;;  %v22_v12 = vld [vmem:[%s1245_s0 + $0x1c] sm:$0xf]  ;;  %v21_v13 = vld [vmem:[%s1245_s0 + $0x18] sm:$0xf] }
   0x7   :  { %42 = vadd.xlane.f32.xlu1 %v41_v6  ;;  %36 = vadd.xlane.f32.xlu0 %v35_v7 }
   0x8   :  { %8 = vsyncpa [#allocation3], 0  ;;  %v53_v14 = vsel %vm31_vm0, %v22_v12, 0.0  ;;  %v50_v15 = vsel %vm31_vm0, %v21_v13, 0.0  ;;  %v24_v16 = vld [vmem:[%s1245_s0 + $0x24] sm:$0xf]  ;;  %v81_v32 = vmul.f32 %v16_v5, %v16_v5  ;;  %v80_v33 = vmul.f32 %v15_v1, %v15_v1 }
   0x9   :  { %v23_v17 = vld [vmem:[%s1245_s0 + $0x20] sm:$0xf]  ;;  %v59_v18 = vsel %vm31_vm0, %v24_v16, 0.0  ;;  %v26_v20 = vld [vmem:[%s1245_s0 + $0x2c] sm:$0xf]  ;;  %v83_v36 = vmul.f32 %v18_v4, %v18_v4  ;;  %v82_v37 = vmul.f32 %v17_v0, %v17_v0  ;;  %v85_v40 = vmul.f32 %v20_v8, %v20_v8  ;;  %s845_s21 = smov [#allocation2]  }
   0xa   :  { %v56_v19 = vsel %vm31_vm0, %v23_v17, 0.0  ;;  %v25_v21 = vld [vmem:[%s1245_s0 + $0x28] sm:$0xf]  ;;  %v65_v22 = vsel %vm31_vm0, %v26_v20, 0.0  ;;  %v28_v24 = vld [vmem:[%s1245_s0 + $0x34] sm:$0xf]  ;;  %v84_v41 = vmul.f32 %v19_v9, %v19_v9  ;;  %v87_v44 = vmul.f32 %v22_v12, %v22_v12 }
   0xb   :  { %48 = vadd.xlane.f32.xlu1 %v47_v10  ;;  %45 = vadd.xlane.f32.xlu0 %v44_v11  ;;  %v62_v23 = vsel %vm31_vm0, %v25_v21, 0.0  ;;  %v27_v25 = vld [vmem:[%s1245_s0 + $0x30] sm:$0xf]  ;;  %v71_v26 = vsel %vm31_vm0, %v28_v24, 0.0  ;;  %v30_v28 = vld [vmem:[%s1245_s0 + $0x3c] sm:$0xf]  ;;  %v86_v45 = vmul.f32 %v21_v13, %v21_v13  ;;  %v89_v48 = vmul.f32 %v24_v16, %v24_v16 }
   0xc   :  { %v68_v27 = vsel %vm31_vm0, %v27_v25, 0.0  ;;  %v29_v29 = vld [vmem:[%s1245_s0 + $0x38] sm:$0xf]  ;;  %v77_v30 = vsel %vm31_vm0, %v30_v28, 0.0  ;;  %v99_v34 = vsel %vm31_vm0, %v81_v32, 0.0  ;;  %v96_v35 = vsel %vm31_vm0, %v80_v33, 0.0 }
   0xd   :  { %v74_v31 = vsel %vm31_vm0, %v29_v29, 0.0  ;;  %v105_v38 = vsel %vm31_vm0, %v83_v36, 0.0  ;;  %v102_v39 = vsel %vm31_vm0, %v82_v37, 0.0  ;;  %v111_v42 = vsel %vm31_vm0, %v85_v40, 0.0  ;;  %s757_s22 = sshll.u32 %s845_s21, 4  ;;  %s758_s22 = int_to_ptr.vmem [resolvable:$true] %s757_s22 }
   0xe   :  { %v108_v43 = vsel %vm31_vm0, %v84_v41, 0.0  ;;  %v117_v46 = vsel %vm31_vm0, %v87_v44, 0.0  ;;  %v114_v47 = vsel %vm31_vm0, %v86_v45, 0.0  ;;  %v88_v49 = vmul.f32 %v23_v17, %v23_v17  ;;  %s822_s25 = scalar_lea.vmem %s758_s22, 1024  ;;  %p827_p1 = scmp.lt.s32.totalorder %s758_s22, %s758_s22 }
   0xf   :  { %54 = vadd.xlane.f32.xlu1 %v53_v14  ;;  %51 = vadd.xlane.f32.xlu0 %v50_v15  ;;  %v123_v50 = vsel %vm31_vm0, %v89_v48, 0.0  ;;  %v91_v52 = vmul.f32 %v26_v20, %v26_v20  ;;  %v90_v53 = vmul.f32 %v25_v21, %v25_v21  ;;  %v93_v56 = vmul.f32 %v28_v24, %v28_v24  ;;  %p823_p0 = scmp.ne.s32.totalorder %s758_s22, %s822_s25  ;;  %p828_p2 = scmp.lt.s32.totalorder %s822_s25, %s822_s25 }
  0x10   :  { %v120_v51 = vsel %vm31_vm0, %v88_v49, 0.0  ;;  %v92_v57 = vmul.f32 %v27_v25, %v27_v25  ;;  %v95_v60 = vmul.f32 %v30_v28, %v30_v28  ;;  %v94_v61 = vmul.f32 %v29_v29, %v29_v29 }
  0x11   :  { %v129_v54 = vsel %vm31_vm0, %v91_v52, 0.0  ;;  %v126_v55 = vsel %vm31_vm0, %v90_v53, 0.0  ;;  %v135_v58 = vsel %vm31_vm0, %v93_v56, 0.0  ;;  %v844_v0 = vmov 0   ;;  %p829_p3 = por %p828_p2, %p827_p1 }
  0x12   :  { %v132_v59 = vsel %vm31_vm0, %v92_v57, 0.0  ;;  %v141_v62 = vsel %vm31_vm0, %v95_v60, 0.0  ;;  %v138_v63 = vsel %vm31_vm0, %v94_v61, 0.0  ;;  %773 = vset.pattern.permute.xlu1 %v844_v0  ;;  %772 = vset.pattern.permute.xlu0 %v844_v0 }
  0x13   :  { %60 = vadd.xlane.f32.xlu1 %v59_v18  ;;  %57 = vadd.xlane.f32.xlu0 %v56_v19  ;;  %p830_p4 = pnand %p829_p3, %p823_p0 }
  0x17   :  { %66 = vadd.xlane.f32.xlu1 %v65_v22  ;;  %63 = vadd.xlane.f32.xlu0 %v62_v23 }
  0x1b   :  { %72 = vadd.xlane.f32.xlu1 %v71_v26  ;;  %69 = vadd.xlane.f32.xlu0 %v68_v27 }
  0x1f   :  { %78 = vadd.xlane.f32.xlu1 %v77_v30  ;;  %75 = vadd.xlane.f32.xlu0 %v74_v31 }
  0x23   :  { %100 = vadd.xlane.f32.xlu1 %v99_v34  ;;  %97 = vadd.xlane.f32.xlu0 %v96_v35 }
  0x27   :  { %106 = vadd.xlane.f32.xlu1 %v105_v38  ;;  %103 = vadd.xlane.f32.xlu0 %v102_v39 }
  0x2b   :  { %112 = vadd.xlane.f32.xlu1 %v111_v42  ;;  %109 = vadd.xlane.f32.xlu0 %v108_v43 }
  0x2f   :  { %118 = vadd.xlane.f32.xlu1 %v117_v46  ;;  %115 = vadd.xlane.f32.xlu0 %v114_v47 }
  0x33   :  { %124 = vadd.xlane.f32.xlu1 %v123_v50  ;;  %121 = vadd.xlane.f32.xlu0 %v120_v51 }
  0x37   :  { %130 = vadd.xlane.f32.xlu1 %v129_v54  ;;  %127 = vadd.xlane.f32.xlu0 %v126_v55 }
  0x3b   :  { %136 = vadd.xlane.f32.xlu1 %v135_v58  ;;  %133 = vadd.xlane.f32.xlu0 %v132_v59 }
  0x3f   :  { %142 = vadd.xlane.f32.xlu1 %v141_v62  ;;  %139 = vadd.xlane.f32.xlu0 %v138_v63 }
  0x8c   :  { %v40_v1 = vpop.xlane.xlu1 %39  ;;  %v34_v2 = vpop.xlane.xlu0 %33 }
  0x8d   :  { %v158_v3 = vsel %vm31_vm0, %v40_v1, 0.0  ;;  %v144_v4 = vsel %vm31_vm0, %v34_v2, 0.0 }
  0x8e   :  { %v159_v5 = vrot.slane %v158_v3, 4  ;;  %v145_v6 = vrot.slane %v144_v4, 4 }
  0x90   :  { %v160_v7 = vadd.f32 %v159_v5, %v158_v3  ;;  %v146_v8 = vadd.f32 %v145_v6, %v144_v4  ;;  %v43_v9 = vpop.xlane.xlu1 %42  ;;  %v37_v10 = vpop.xlane.xlu0 %36 }
  0x91   :  { %v165_v11 = vsel %vm31_vm0, %v43_v9, 0.0  ;;  %v151_v12 = vsel %vm31_vm0, %v37_v10, 0.0 }
  0x92   :  { %v161_v13 = vrot.slane %v160_v7, 2  ;;  %v147_v14 = vrot.slane %v146_v8, 2  ;;  %v166_v15 = vrot.slane %v165_v11, 4  ;;  %v152_v16 = vrot.slane %v151_v12, 4 }
  0x94   :  { %v162_v17 = vadd.f32 %v161_v13, %v160_v7  ;;  %v148_v18 = vadd.f32 %v147_v14, %v146_v8  ;;  %v167_v19 = vadd.f32 %v166_v15, %v165_v11  ;;  %v153_v20 = vadd.f32 %v152_v16, %v151_v12  ;;  %v49_v21 = vpop.xlane.xlu1 %48  ;;  %v46_v22 = vpop.xlane.xlu0 %45 }
  0x95   :  { %v179_v23 = vsel %vm31_vm0, %v49_v21, 0.0  ;;  %v172_v24 = vsel %vm31_vm0, %v46_v22, 0.0 }
  0x96   :  { %v163_v25 = vrot.slane %v162_v17, 1  ;;  %v149_v26 = vrot.slane %v148_v18, 1  ;;  %v168_v27 = vrot.slane %v167_v19, 2  ;;  %v154_v28 = vrot.slane %v153_v20, 2 }
  0x97   :  { %v180_v29 = vrot.slane %v179_v23, 4  ;;  %v173_v30 = vrot.slane %v172_v24, 4 }
  0x98   :  { %v55_v31 = vpop.xlane.xlu1 %54  ;;  %v52_v32 = vpop.xlane.xlu0 %51  ;;  %v164_v37 = vadd.f32 %v163_v25, %v162_v17  ;;  %v150_v38 = vadd.f32 %v149_v26, %v148_v18  ;;  %v169_v39 = vadd.f32 %v168_v27, %v167_v19  ;;  %v155_v40 = vadd.f32 %v154_v28, %v153_v20 }
  0x99   :  { %v181_v33 = vadd.f32 %v180_v29, %v179_v23  ;;  %v174_v34 = vadd.f32 %v173_v30, %v172_v24  ;;  %v193_v35 = vsel %vm31_vm0, %v55_v31, 0.0  ;;  %v186_v36 = vsel %vm31_vm0, %v52_v32, 0.0 }
  0x9a   :  { %v194_v43 = vrot.slane %v193_v35, 4  ;;  %v187_v44 = vrot.slane %v186_v36, 4  ;;  %v956_v51 = vmul.f32 0.001953125, %v164_v37  ;;  %v958_v52 = vmul.f32 0.001953125, %v150_v38 }
  0x9b   :  { %v182_v41 = vrot.slane %v181_v33, 2  ;;  %v175_v42 = vrot.slane %v174_v34, 2  ;;  %v170_v55 = vrot.slane %v169_v39, 1  ;;  %v156_v56 = vrot.slane %v155_v40, 1 }
  0x9c   :  { %v61_v45 = vpop.xlane.xlu1 %60  ;;  %v58_v46 = vpop.xlane.xlu0 %57  ;;  %v195_v49 = vadd.f32 %v194_v43, %v193_v35  ;;  %v188_v50 = vadd.f32 %v187_v44, %v186_v36  ;;  %v966_v7 = vmul.f32 %v956_v51, %v956_v51  ;;  %v970_v8 = vmul.f32 %v958_v52, %v958_v52 }
  0x9d   :  { %v183_v47 = vadd.f32 %v182_v41, %v181_v33  ;;  %v176_v48 = vadd.f32 %v175_v42, %v174_v34  ;;  %v207_v53 = vsel %vm31_vm0, %v61_v45, 0.0  ;;  %v200_v54 = vsel %vm31_vm0, %v58_v46, 0.0 }
  0x9e   :  { %v196_v57 = vrot.slane %v195_v49, 2  ;;  %v189_v58 = vrot.slane %v188_v50, 2  ;;  %v208_v59 = vrot.slane %v207_v53, 4  ;;  %v201_v60 = vrot.slane %v200_v54, 4 }
  0x9f   :  { %v184_v63 = vrot.slane %v183_v47, 1  ;;  %v177_v0 = vrot.slane %v176_v48, 1  ;;  %v171_v9 = vadd.f32 %v170_v55, %v169_v39  ;;  %v157_v10 = vadd.f32 %v156_v56, %v155_v40 }
  0xa0   :  { %v67_v61 = vpop.xlane.xlu1 %66  ;;  %v64_v62 = vpop.xlane.xlu0 %63  ;;  %v197_v1 = vadd.f32 %v196_v57, %v195_v49  ;;  %v190_v2 = vadd.f32 %v189_v58, %v188_v50  ;;  %v209_v3 = vadd.f32 %v208_v59, %v207_v53  ;;  %v202_v4 = vadd.f32 %v201_v60, %v200_v54 }
  0xa1   :  { %v221_v5 = vsel %vm31_vm0, %v67_v61, 0.0  ;;  %v214_v6 = vsel %vm31_vm0, %v64_v62, 0.0  ;;  %v185_v17 = vadd.f32 %v184_v63, %v183_v47  ;;  %v178_v18 = vadd.f32 %v177_v0, %v176_v48 }
  0xa2   :  { %v210_v11 = vrot.slane %v209_v3, 2  ;;  %v203_v12 = vrot.slane %v202_v4, 2  ;;  %v222_v13 = vrot.slane %v221_v5, 4  ;;  %v215_v14 = vrot.slane %v214_v6, 4 }
  0xa3   :  { %v198_v19 = vrot.slane %v197_v1, 1  ;;  %v191_v20 = vrot.slane %v190_v2, 1  ;;  %v972_v25 = vmul.f32 0.001953125, %v171_v9  ;;  %v974_v26 = vmul.f32 0.001953125, %v157_v10 }
  0xa4   :  { %v73_v15 = vpop.xlane.xlu1 %72  ;;  %v70_v16 = vpop.xlane.xlu0 %69  ;;  %v211_v21 = vadd.f32 %v210_v11, %v209_v3  ;;  %v204_v22 = vadd.f32 %v203_v12, %v202_v4  ;;  %v223_v23 = vadd.f32 %v222_v13, %v221_v5  ;;  %v216_v24 = vadd.f32 %v215_v14, %v214_v6 }
  0xa5   :  { %v235_v27 = vsel %vm31_vm0, %v73_v15, 0.0  ;;  %v228_v28 = vsel %vm31_vm0, %v70_v16, 0.0  ;;  %v978_v35 = vmul.f32 0.001953125, %v185_v17  ;;  %v980_v36 = vmul.f32 0.001953125, %v178_v18 }
  0xa6   :  { %v212_v29 = vrot.slane %v211_v21, 1  ;;  %v205_v30 = vrot.slane %v204_v22, 1  ;;  %v224_v31 = vrot.slane %v223_v23, 2  ;;  %v217_v32 = vrot.slane %v216_v24, 2 }
  0xa7   :  { %v236_v37 = vrot.slane %v235_v27, 4  ;;  %v229_v38 = vrot.slane %v228_v28, 4  ;;  %v199_v39 = vadd.f32 %v198_v19, %v197_v1  ;;  %v192_v40 = vadd.f32 %v191_v20, %v190_v2 }
  0xa8   :  { %v79_v33 = vpop.xlane.xlu1 %78  ;;  %v76_v34 = vpop.xlane.xlu0 %75  ;;  %v225_v41 = vadd.f32 %v224_v31, %v223_v23  ;;  %v218_v42 = vadd.f32 %v217_v32, %v216_v24  ;;  %v213_v47 = vadd.f32 %v212_v29, %v211_v21  ;;  %v206_v48 = vadd.f32 %v205_v30, %v204_v22 }
  0xa9   :  { %v237_v43 = vadd.f32 %v236_v37, %v235_v27  ;;  %v230_v44 = vadd.f32 %v229_v38, %v228_v28  ;;  %v249_v45 = vsel %vm31_vm0, %v79_v33, 0.0  ;;  %v242_v46 = vsel %vm31_vm0, %v76_v34, 0.0 }
  0xaa   :  { %v226_v49 = vrot.slane %v225_v41, 1  ;;  %v219_v50 = vrot.slane %v218_v42, 1  ;;  %v250_v57 = vrot.slane %v249_v45, 4  ;;  %v243_v58 = vrot.slane %v242_v46, 4 }
  0xab   :  { %v238_v55 = vrot.slane %v237_v43, 2  ;;  %v231_v56 = vrot.slane %v230_v44, 2  ;;  %v986_v59 = vmul.f32 %v972_v25, %v972_v25  ;;  %v990_v60 = vmul.f32 %v974_v26, %v974_v26 }
  0xac   :  { %v101_v53 = vpop.xlane.xlu1 %100  ;;  %v98_v54 = vpop.xlane.xlu0 %97  ;;  %v992_v61 = vmul.f32 0.001953125, %v199_v39  ;;  %v994_v62 = vmul.f32 0.001953125, %v192_v40  ;;  %v227_v63 = vadd.f32 %v226_v49, %v225_v41  ;;  %v220_v0 = vadd.f32 %v219_v50, %v218_v42 }
  0xad   :  { %v239_v1 = vadd.f32 %v238_v55, %v237_v43  ;;  %v251_v2 = vadd.f32 %v250_v57, %v249_v45  ;;  %v998_v3 = vmul.f32 %v978_v35, %v978_v35  ;;  %v1002_v4 = vmul.f32 %v980_v36, %v980_v36 }
  0xae   :  { %v279_v5 = vsel %vm31_vm0, %v101_v53, 0.0  ;;  %v272_v6 = vsel %vm31_vm0, %v98_v54, 0.0  ;;  %v1006_v11 = vmul.f32 0.001953125, %v213_v47  ;;  %v1008_v12 = vmul.f32 0.001953125, %v206_v48 }
  0xaf   :  { %v232_v13 = vadd.f32 %v231_v56, %v230_v44  ;;  %v244_v14 = vadd.f32 %v243_v58, %v242_v46  ;;  %v1012_v15 = vmul.f32 %v992_v61, %v992_v61  ;;  %v1016_v16 = vmul.f32 %v994_v62, %v994_v62 }
  0xb0   :  { %v107_v9 = vpop.xlane.xlu1 %106  ;;  %v104_v10 = vpop.xlane.xlu0 %103  ;;  %v280_v17 = vrot.slane %v279_v5, 4  ;;  %v273_v18 = vrot.slane %v272_v6, 4  ;;  %v1018_v19 = vmul.f32 0.001953125, %v227_v63  ;;  %v1020_v20 = vmul.f32 0.001953125, %v220_v0 }
  0xb1   :  { %v240_v21 = vrot.slane %v239_v1, 1  ;;  %v252_v22 = vrot.slane %v251_v2, 2  ;;  %v293_v27 = vsel %vm31_vm0, %v107_v9, 0.0  ;;  %v286_v28 = vsel %vm31_vm0, %v104_v10, 0.0 }
  0xb2   :  { %v281_v23 = vadd.f32 %v280_v17, %v279_v5  ;;  %v274_v24 = vadd.f32 %v273_v18, %v272_v6  ;;  %v1026_v31 = vmul.f32 %v1006_v11, %v1006_v11  ;;  %v1030_v32 = vmul.f32 %v1008_v12, %v1008_v12 }
  0xb3   :  { %v233_v33 = vrot.slane %v232_v13, 1  ;;  %v245_v34 = vrot.slane %v244_v14, 2  ;;  %v294_v39 = vrot.slane %v293_v27, 4  ;;  %v287_v40 = vrot.slane %v286_v28, 4 }
  0xb4   :  { %v113_v29 = vpop.xlane.xlu1 %112  ;;  %v110_v30 = vpop.xlane.xlu0 %109  ;;  %v282_v37 = vrot.slane %v281_v23, 2  ;;  %v275_v38 = vrot.slane %v274_v24, 2  ;;  %v1034_v41 = vmul.f32 %v1018_v19, %v1018_v19  ;;  %v1038_v42 = vmul.f32 %v1020_v20, %v1020_v20 }
  0xb5   :  { %v241_v43 = vadd.f32 %v240_v21, %v239_v1  ;;  %v253_v44 = vadd.f32 %v252_v22, %v251_v2  ;;  %v295_v47 = vadd.f32 %v294_v39, %v293_v27  ;;  %v288_v48 = vadd.f32 %v287_v40, %v286_v28 }
  0xb6   :  { %v283_v45 = vadd.f32 %v282_v37, %v281_v23  ;;  %v276_v46 = vadd.f32 %v275_v38, %v274_v24  ;;  %v234_v49 = vadd.f32 %v233_v33, %v232_v13  ;;  %v1040_v50 = vadd.f32 %v245_v34, %v244_v14 }
  0xb7   :  { %v307_v53 = vsel %vm31_vm0, %v113_v29, 0.0  ;;  %v300_v54 = vsel %vm31_vm0, %v110_v30, 0.0  ;;  %v296_v57 = vrot.slane %v295_v47, 2  ;;  %v289_v58 = vrot.slane %v288_v48, 2 }
  0xb8   :  { %v284_v55 = vrot.slane %v283_v45, 1  ;;  %v277_v56 = vrot.slane %v276_v46, 1  ;;  %v119_v63 = vpop.xlane.xlu1 %118  ;;  %v116_v0 = vpop.xlane.xlu0 %115  ;;  %v1044_v5 = vmul.f32 0.001953125, %v241_v43  ;;  %v254_v1 = vrot.slane %v253_v44, 1 }
  0xb9   :  { %v308_v2 = vrot.slane %v307_v53, 4  ;;  %v301_v6 = vrot.slane %v300_v54, 4  ;;  %v297_v13 = vadd.f32 %v296_v57, %v295_v47  ;;  %v290_v14 = vadd.f32 %v289_v58, %v288_v48 }
  0xba   :  { %v285_v9 = vadd.f32 %v284_v55, %v283_v45  ;;  %v278_v10 = vadd.f32 %v277_v56, %v276_v46  ;;  %v321_v21 = vsel %vm31_vm0, %v119_v63, 0.0  ;;  %v314_v22 = vsel %vm31_vm0, %v116_v0, 0.0 }
  0xbb   :  { %v309_v17 = vadd.f32 %v308_v2, %v307_v53  ;;  %v302_v18 = vadd.f32 %v301_v6, %v300_v54  ;;  %v298_v27 = vrot.slane %v297_v13, 1  ;;  %v291_v28 = vrot.slane %v290_v14, 1 }
  0xbc   :  { %v385_v23 = vmul.f32 0.001953125, %v285_v9  ;;  %v384_v24 = vmul.f32 0.001953125, %v278_v10  ;;  %v322_v33 = vrot.slane %v321_v21, 4  ;;  %v315_v34 = vrot.slane %v314_v22, 4  ;;  %v125_v43 = vpop.xlane.xlu1 %124  ;;  %v122_v57 = vpop.xlane.xlu0 %121 }
  0xbd   :  { %v310_v29 = vrot.slane %v309_v17, 2  ;;  %v303_v30 = vrot.slane %v302_v18, 2  ;;  %v299_v39 = vadd.f32 %v298_v27, %v297_v13  ;;  %v292_v40 = vadd.f32 %v291_v28, %v290_v14 }
  0xbe   :  { %v417_v37 = vsub.f32 %v385_v23, %v990_v60  ;;  %v416_v38 = vsub.f32 %v384_v24, %v970_v8  ;;  %v323_v47 = vadd.f32 %v322_v33, %v321_v21  ;;  %v316_v48 = vadd.f32 %v315_v34, %v314_v22 }
  0xbf   :  { %v311_v45 = vadd.f32 %v310_v29, %v309_v17  ;;  %v304_v46 = vadd.f32 %v303_v30, %v302_v18  ;;  %v1050_v53 = vmul.f32 0.001953125, %v234_v49  ;;  %v387_v55 = vmul.f32 0.001953125, %v299_v39 }
  0xc0   :  { %v433_v54 = vmax.f32 %v417_v37, 0.0  ;;  %v386_v56 = vmul.f32 0.001953125, %v292_v40  ;;  %v324_v0 = vrot.slane %v323_v47, 2  ;;  %v317_v2 = vrot.slane %v316_v48, 2  ;;  %v131_v23 = vpop.xlane.xlu1 %130  ;;  %v128_v30 = vpop.xlane.xlu0 %127 }
  0xc1   :  { %v312_v58 = vrot.slane %v311_v45, 1  ;;  %v305_v63 = vrot.slane %v304_v46, 1  ;;  %v255_v60 = vadd.f32 %v254_v1, %v253_v44  ;;  %v432_v6 = vmax.f32 %v416_v38, 0.0 }
  0xc2   :  { %v419_v8 = vsub.f32 %v387_v55, %v986_v59  ;;  %v418_v9 = vsub.f32 %v386_v56, %v966_v7  ;;  %v325_v14 = vadd.f32 %v324_v0, %v323_v47  ;;  %v318_v17 = vadd.f32 %v317_v2, %v316_v48 }
  0xc3   :  { %v313_v10 = vadd.f32 %v312_v58, %v311_v45  ;;  %v306_v13 = vadd.f32 %v305_v63, %v304_v46  ;;  %v247_v49 = vrot.slane %v1040_v50, 1  ;;  %v449_v18 = vadd.f32 1e-05, %v433_v54 }
  0xc4   :  { %v435_v21 = vmax.f32 %v419_v8, 0.0  ;;  %v335_v22 = vsel %vm31_vm0, %v125_v43, 0.0  ;;  %v434_v24 = vmax.f32 %v418_v9, 0.0  ;;  %v326_v44 = vrot.slane %v325_v14, 1 }
  0xc5   :  { %v389_v27 = vmul.f32 0.001953125, %v313_v10  ;;  %v388_v28 = vmul.f32 0.001953125, %v306_v13  ;;  %v1058_v59 = vmul.f32 %v1044_v5, %v1044_v5  ;;  %v1060_v7 = vmul.f32 0.001953125, %v255_v60 }
  0xc6   :  { %v319_v1 = vrot.slane %v318_v17, 1  ;;  %v336_v29 = vrot.slane %v335_v22, 4  ;;  %v448_v33 = vadd.f32 1e-05, %v432_v6  ;;  %v328_v38 = vsel %vm31_vm0, %v122_v57, 0.0  ;;  %v134_v6 = vpop.xlane.xlu0 %133 }
  0xc7   :  { %v421_v34 = vsub.f32 %v389_v27, %v998_v3  ;;  %v420_v37 = vsub.f32 %v388_v28, %v1002_v4  ;;  %v1066_v39 = vadd.f32 %v247_v49, %v1040_v50  ;;  %v327_v40 = vadd.f32 %v326_v44, %v325_v14  ;;  %v137_v3 = vpop.xlane.xlu1 %136 }
  0xc8   :  { %v337_v43 = vadd.f32 %v336_v29, %v335_v22  ;;  %v329_v45 = vrot.slane %v328_v38, 4  ;;  %774 = vrsqrt.f32 %v449_v18  ;;  %v451_v46 = vadd.f32 1e-05, %v435_v21 }
  0xc9   :  { %v450_v47 = vadd.f32 1e-05, %v434_v24  ;;  %v320_v48 = vadd.f32 %v319_v1, %v318_v17  ;;  %v437_v54 = vmax.f32 %v421_v34, 0.0  ;;  %v349_v58 = vsel %vm31_vm0, %v131_v23, 0.0 }
  0xca   :  { %v338_v55 = vrot.slane %v337_v43, 2  ;;  %v330_v56 = vadd.f32 %v329_v45, %v328_v38  ;;  %v1071_v4 = vmul.f32 %v1060_v7, %v1060_v7  ;;  %776 = vrsqrt.f32 %v448_v33 }
  0xcb   :  { %v436_v50 = vmax.f32 %v420_v37, 0.0  ;;  %v350_v57 = vrot.slane %v349_v58, 4  ;;  %v391_v63 = vmul.f32 0.001953125, %v327_v40  ;;  %v342_v60 = vsel %vm31_vm0, %v128_v30, 0.0  ;;  %v143_v44 = vpop.xlane.xlu1 %142  ;;  %v140_v40 = vpop.xlane.xlu0 %139 }
  0xcc   :  { %v339_v0 = vadd.f32 %v338_v55, %v337_v43  ;;  %v331_v2 = vrot.slane %v330_v56, 2  ;;  %778 = vrsqrt.f32 %v451_v46  ;;  %v390_v8 = vmul.f32 0.001953125, %v320_v48 }
  0xcd   :  { %v351_v9 = vadd.f32 %v350_v57, %v349_v58  ;;  %v343_v10 = vrot.slane %v342_v60, 4  ;;  %780 = vrsqrt.f32 %v450_v47  ;;  %v453_v13 = vadd.f32 1e-05, %v437_v54 }
  0xce   :  { %v340_v14 = vrot.slane %v339_v0, 1  ;;  %v332_v17 = vadd.f32 %v331_v2, %v330_v56  ;;  %v452_v49 = vadd.f32 1e-05, %v436_v50  ;;  %v363_v22 = vsel %vm31_vm0, %v137_v3, 0.0 }
  0xcf   :  { %v352_v18 = vrot.slane %v351_v9, 2  ;;  %v344_v21 = vadd.f32 %v343_v10, %v342_v60  ;;  %v423_v23 = vsub.f32 %v391_v63, %v1012_v15  ;;  %v364_v28 = vrot.slane %v363_v22, 4 }
  0xd0   :  { %v341_v24 = vadd.f32 %v340_v14, %v339_v0  ;;  %v333_v27 = vrot.slane %v332_v17, 1  ;;  %v422_v1 = vsub.f32 %v390_v8, %v1016_v16  ;;  %v356_v33 = vsel %vm31_vm0, %v134_v6, 0.0 }
  0xd1   :  { %v353_v29 = vadd.f32 %v352_v18, %v351_v9  ;;  %v345_v30 = vrot.slane %v344_v21, 2  ;;  %782 = vrsqrt.f32 %v453_v13  ;;  %v365_v38 = vadd.f32 %v364_v28, %v363_v22  ;;  %v1085_v22 = vld [vmem:[%s1246_s1 + $0x4] sm:$0xf] }
  0xd2   :  { %v393_v34 = vmul.f32 0.001953125, %v341_v24  ;;  %v334_v37 = vadd.f32 %v333_v27, %v332_v17  ;;  %v357_v46 = vrot.slane %v356_v33, 4  ;;  %v377_v15 = vsel %vm31_vm0, %v143_v44, 0.0 }
  0xd3   :  { %v354_v43 = vrot.slane %v353_v29, 1  ;;  %v346_v45 = vadd.f32 %v345_v30, %v344_v21  ;;  %784 = vrsqrt.f32 %v452_v49  ;;  %v366_v48 = vrot.slane %v365_v38, 2 }
  0xd4   :  { %v425_v47 = vsub.f32 %v393_v34, %v1026_v31  ;;  %v378_v54 = vrot.slane %v377_v15, 4  ;;  %v358_v56 = vadd.f32 %v357_v46, %v356_v33  ;;  %v370_v58 = vsel %vm31_vm0, %v140_v40, 0.0  ;;  %v1096_v34 = vld [vmem:[%s1246_s1 + $0x8] sm:$0xf] }
  0xd5   :  { %v355_v16 = vadd.f32 %v354_v43, %v353_v29  ;;  %v347_v55 = vrot.slane %v346_v45, 1  ;;  %v775_v3 = vpop.eup %774  ;;  %v392_v57 = vmul.f32 0.001953125, %v334_v37  ;;  %v367_v63 = vadd.f32 %v366_v48, %v365_v38 }
  0xd6   :  { %v441_v50 = vmax.f32 %v425_v47, 0.0  ;;  %v379_v0 = vadd.f32 %v378_v54, %v377_v15  ;;  %v359_v6 = vrot.slane %v358_v56, 2  ;;  %v371_v8 = vrot.slane %v370_v58, 4 }
  0xd7   :  { %v395_v2 = vmul.f32 0.001953125, %v355_v16  ;;  %v348_v60 = vadd.f32 %v347_v55, %v346_v45  ;;  %v777_v9 = vpop.eup %776  ;;  %v438_v10 = vmax.f32 %v422_v1, 0.0  ;;  %v368_v31 = vrot.slane %v367_v63, 1  ;;  %v1091_v1 = vld [vmem:[%s1246_s1] sm:$0xf] }
  0xd8   :  { %v457_v13 = vadd.f32 1e-05, %v441_v50  ;;  %v380_v14 = vrot.slane %v379_v0, 2  ;;  %v439_v17 = vmax.f32 %v423_v23, 0.0  ;;  %v360_v18 = vadd.f32 %v359_v6, %v358_v56 }
  0xd9   :  { %v427_v49 = vsub.f32 %v395_v2, %v1034_v41  ;;  %v372_v21 = vadd.f32 %v371_v8, %v370_v58  ;;  %v779_v24 = vpop.eup %778  ;;  %v424_v27 = vsub.f32 %v392_v57, %v1030_v32  ;;  %v369_v28 = vadd.f32 %v368_v31, %v367_v63 }
  0xda   :  { %786 = vrsqrt.f32 %v457_v13  ;;  %v381_v44 = vadd.f32 %v380_v14, %v379_v0  ;;  %v781_v23 = vpop.eup %780  ;;  %v394_v29 = vmul.f32 0.001953125, %v348_v60  ;;  %v361_v30 = vrot.slane %v360_v18, 1 }
  0xdb   :  { %v443_v41 = vmax.f32 %v427_v49, 0.0  ;;  %v373_v33 = vrot.slane %v372_v21, 2  ;;  %v454_v37 = vadd.f32 1e-05, %v438_v10  ;;  %v397_v38 = vmul.f32 0.001953125, %v369_v28 }
  0xdc   :  { %v382_v32 = vrot.slane %v381_v44, 1  ;;  %v1099_v40 = vmul.f32 %v775_v3, %v1085_v22  ;;  %v455_v43 = vadd.f32 1e-05, %v439_v17  ;;  %v362_v46 = vadd.f32 %v361_v30, %v360_v18  ;;  %v484_v49 = vld [vmem:[%s1246_s1 + $0x10] sm:$0xf] }
  0xdd   :  { %v459_v45 = vadd.f32 1e-05, %v443_v41  ;;  %v374_v15 = vadd.f32 %v373_v33, %v372_v21  ;;  %v429_v47 = vsub.f32 %v397_v38, %v1058_v59  ;;  %v1104_v54 = vmul.f32 %v777_v9, %v1091_v1  ;;  %v483_v59 = vld [vmem:[%s1246_s1 + $0xc] sm:$0xf] }
  0xde   :  { %v383_v48 = vadd.f32 %v382_v32, %v381_v44  ;;  %551 = vperm.xlu1 %773, %v1099_v40   ;;  %v1107_v16 = vmul.f32 %v781_v23, %v1096_v34  ;;  %v783_v55 = vpop.eup %782  ;;  %v440_v56 = vmax.f32 %v424_v27, 0.0  ;;  %v426_v58 = vsub.f32 %v394_v29, %v1038_v42  ;;  %v485_v23 = vld [vmem:[%s1246_s1 + $0x14] sm:$0xf]  ;;  %v486_v32 = vld [vmem:[%s1246_s1 + $0x18] sm:$0xf] }
  0xdf   :  { %788 = vrsqrt.f32 %v459_v45  ;;  %v375_v3 = vrot.slane %v374_v15, 1  ;;  %v445_v50 = vmax.f32 %v429_v47, 0.0  ;;  %v396_v57 = vmul.f32 0.001953125, %v362_v46  ;;  %546 = vperm.xlu0 %772, %v1104_v54  }
  0xe0   :  { %790 = vrsqrt.f32 %v454_v37  ;;  %v399_v63 = vmul.f32 0.001953125, %v383_v48  ;;  %v785_v0 = vpop.eup %784  ;;  %v412_v60 = vmul.f32 %v1050_v53, %v1050_v53  ;;  %v1117_v6 = vmul.f32 0.001953125, %v1066_v39 }
  0xe1   :  { %v376_v2 = vadd.f32 %v375_v3, %v374_v15  ;;  %v461_v42 = vadd.f32 1e-05, %v445_v50  ;;  %792 = vrsqrt.f32 %v455_v43  ;;  %v456_v9 = vadd.f32 1e-05, %v440_v56  ;;  %v487_v15 = vld [vmem:[%s1246_s1 + $0x1c] sm:$0xf] }
  0xe2   :  { %v431_v8 = vsub.f32 %v399_v63, %v1071_v4  ;;  %556 = vperm.xlu1 %773, %v1107_v16   ;;  %v442_v10 = vmax.f32 %v426_v58, 0.0  ;;  %v499_v13 = vmul.f32 %v779_v24, %v483_v59  ;;  %v428_v31 = vsub.f32 %v396_v57, %v412_v60  ;;  %v489_v50 = vld [vmem:[%s1247_s2 + $0x4] sm:$0xf] }
  0xe3   :  { %794 = vrsqrt.f32 %v461_v42  ;;  %v398_v17 = vmul.f32 0.001953125, %v376_v2  ;;  %v414_v39 = vmul.f32 %v1117_v6, %v1117_v6  ;;  %v1126_v27 = vmul.f32 %v785_v0, %v484_v49  ;;  %v491_v2 = vld [vmem:[%s1247_s2 + $0xc] sm:$0xf] }
  0xe4   :  { %v447_v14 = vmax.f32 %v431_v8, 0.0  ;;  %796 = vrsqrt.f32 %v456_v9  ;;  %v458_v21 = vadd.f32 1e-05, %v442_v10  ;;  %v444_v28 = vmax.f32 %v428_v31, 0.0  ;;  %v488_v31 = vld [vmem:[%s1247_s2] sm:$0xf] }
  0xe5   :  { %v430_v24 = vsub.f32 %v398_v17, %v414_v39  ;;  %v501_v33 = vmul.f32 %v783_v55, %v485_v23  ;;  %v513_v3 = vmul.f32 %v1099_v40, %v974_v26  ;;  %v515_v0 = vmul.f32 %v499_v13, %v972_v25  ;;  %v490_v39 = vld [vmem:[%s1247_s2 + $0x8] sm:$0xf] }
  0xe6   :  { %v463_v18 = vadd.f32 1e-05, %v447_v14  ;;  %561 = vperm.xlu1 %773, %v499_v13   ;;  %v460_v29 = vadd.f32 1e-05, %v444_v28 }
  0xe7   :  { %v787_v4 = vpop.eup %786  ;;  %v446_v30 = vmax.f32 %v430_v24, 0.0  ;;  %v531_v40 = vsub.f32 %v491_v2, %v515_v0  ;;  %v517_v42 = vmul.f32 %v501_v33, %v978_v35  ;;  %v512_v35 = vmul.f32 %v1104_v54, %v958_v52 }
  0xe8   :  { %798 = vrsqrt.f32 %v463_v18  ;;  %v505_v44 = vmul.f32 %v787_v4, %v1085_v22  ;;  %v516_v4 = vmul.f32 %v1126_v27, %v980_v36 }
  0xe9   :  { %800 = vrsqrt.f32 %v458_v21  ;;  %v462_v43 = vadd.f32 1e-05, %v446_v30 }
  0xea   :  { %566 = vperm.xlu1 %773, %v1126_v27   ;;  %591 = vperm.xlu0 %772, %v505_v44   ;;  %802 = vrsqrt.f32 %v460_v29  ;;  %v521_v17 = vmul.f32 %v505_v44, %v1006_v11  ;;  %v492_v11 = vld [vmem:[%s1247_s2 + $0x10] sm:$0xf] }
  0xeb   :  { %804 = vrsqrt.f32 %v462_v43 }
  0xec   :  { %v789_v41 = vpop.eup %788  ;;  %v537_v18 = vsub.f32 %v489_v50, %v521_v17 }
  0xed   :  { %v791_v37 = vpop.eup %790  ;;  %v507_v38 = vmul.f32 %v789_v41, %v483_v59  ;;  %v529_v59 = vsub.f32 %v489_v50, %v513_v3  ;;  %v807_v50 = vld [vmem:[%s1245_s0 + $0xc] sm:$0xf] }
  0xee   :  { %571 = vperm.xlu1 %773, %v501_v33   ;;  %v793_v22 = vpop.eup %792  ;;  %v502_v45 = vmul.f32 %v791_v37, %v486_v32 }
  0xef   :  { %601 = vperm.xlu0 %772, %v507_v38   ;;  %v503_v55 = vmul.f32 %v793_v22, %v487_v15  ;;  %v523_v52 = vmul.f32 %v507_v38, %v1018_v19  ;;  %v494_v19 = vld [vmem:[%s1247_s2 + $0x18] sm:$0xf] }
  0xf0   :  { %v795_v46 = vpop.eup %794  ;;  %v518_v28 = vmul.f32 %v502_v45, %v994_v62 }
  0xf1   :  { %v509_v47 = vmul.f32 %v795_v46, %v485_v23  ;;  %v797_v48 = vpop.eup %796  ;;  %v519_v10 = vmul.f32 %v503_v55, %v992_v61  ;;  %v514_v61 = vmul.f32 %v1107_v16, %v956_v51  ;;  %v539_v21 = vsub.f32 %v491_v2, %v523_v52  ;;  %v808_v2 = vld [vmem:[%s1245_s0 + $0x14] sm:$0xf]  ;;  %v813_v52 = vld [vmem:[%s1245_s0 + $0x2c] sm:$0xf] }
  0xf2   :  { %576 = vperm.xlu1 %773, %v502_v45   ;;  %v504_v57 = vmul.f32 %v797_v48, %v1091_v1  ;;  %v493_v1 = vld [vmem:[%s1247_s2 + $0x14] sm:$0xf]  ;;  %v532_v16 = vsub.f32 %v492_v11, %v516_v4  ;;  %v534_v27 = vsub.f32 %v494_v19, %v518_v28 }
  0xf3   :  { %611 = vperm.xlu0 %772, %v509_v47   ;;  %v533_v25 = vsub.f32 %v493_v1, %v517_v42  ;;  %v530_v54 = vsub.f32 %v490_v39, %v514_v61  ;;  %v525_v51 = vmul.f32 %v509_v47, %v1044_v5 }
  0xf4   :  { %v520_v44 = vmul.f32 %v504_v57, %v1008_v12 }
  0xf5   :  { %v799_v56 = vpop.eup %798  ;;  %v541_v24 = vsub.f32 %v493_v1, %v525_v51  ;;  %v809_v1 = vld [vmem:[%s1245_s0 + $0x1c] sm:$0xf] }
  0xf6   :  { %581 = vperm.xlu1 %773, %v503_v55   ;;  %v511_v58 = vmul.f32 %v799_v56, %v487_v15  ;;  %v801_v63 = vpop.eup %800  ;;  %v536_v5 = vsub.f32 %v488_v31, %v520_v44  ;;  %v816_v44 = vld [vmem:[%s1245_s0 + $0x18] sm:$0xf] }
  0xf7   :  { %v506_v60 = vmul.f32 %v801_v63, %v1096_v34  ;;  %v803_v26 = vpop.eup %802  ;;  %v495_v34 = vld [vmem:[%s1247_s2 + $0x1c] sm:$0xf] }
  0xf8   :  { %621 = vperm.xlu0 %772, %v511_v58   ;;  %v508_v8 = vmul.f32 %v803_v26, %v484_v49  ;;  %v805_v9 = vpop.eup %804  ;;  %v535_v14 = vsub.f32 %v495_v34, %v519_v10  ;;  %v528_v49 = vsub.f32 %v488_v31, %v512_v35  ;;  %v527_v36 = vmul.f32 %v511_v58, %v1060_v7  ;;  %v811_v35 = vld [vmem:[%s1245_s0 + $0x24] sm:$0xf] }
  0xf9   :  { %v510_v13 = vmul.f32 %v805_v9, %v486_v32  ;;  %v522_v41 = vmul.f32 %v506_v60, %v1020_v20 }
  0xfa   :  { %586 = vperm.xlu1 %773, %v504_v57   ;;  %v543_v23 = vsub.f32 %v495_v34, %v527_v36  ;;  %v524_v29 = vmul.f32 %v508_v8, %v1050_v53 }
  0xfb   :  { %v538_v62 = vsub.f32 %v490_v39, %v522_v41  ;;  %v526_v33 = vmul.f32 %v510_v13, %v1117_v6  ;;  %v806_v6 = vld [vmem:[%s1245_s0 + $0x4] sm:$0xf] }
  0xfc   :  { %647 = vperm.xlu0 %772, %v529_v59   ;;  %v540_v30 = vsub.f32 %v492_v11, %v524_v29 }
  0xfd   :  { %v542_v7 = vsub.f32 %v494_v19, %v526_v33  ;;  %v815_v19 = vld [vmem:[%s1245_s0 + $0x34] sm:$0xf] }
  0xfe   :  { %596 = vperm.xlu1 %773, %v506_v60  }
 0x100   :  { %657 = vperm.xlu0 %772, %v531_v40  }
 0x102   :  { %606 = vperm.xlu1 %773, %v508_v8  }
 0x104   :  { %667 = vperm.xlu0 %772, %v533_v25   ;;  %v810_v25 = vld [vmem:[%s1245_s0] sm:$0xf] }
 0x106   :  { %616 = vperm.xlu1 %773, %v510_v13  }
 0x108   :  { %677 = vperm.xlu0 %772, %v535_v14  }
 0x10a   :  { %642 = vperm.xlu1 %773, %v528_v49   ;;  %v812_v49 = vld [vmem:[%s1245_s0 + $0x8] sm:$0xf] }
 0x10c   :  { %687 = vperm.xlu0 %772, %v537_v18  }
 0x10e   :  { %652 = vperm.xlu1 %773, %v530_v54  }
 0x110   :  { %697 = vperm.xlu0 %772, %v539_v21   ;;  %v814_v21 = vld [vmem:[%s1245_s0 + $0x10] sm:$0xf] }
 0x112   :  { %662 = vperm.xlu1 %773, %v532_v16  }
 0x114   :  { %707 = vperm.xlu0 %772, %v541_v24  }
 0x116   :  { %672 = vperm.xlu1 %773, %v534_v27  }
 0x118   :  { %717 = vperm.xlu0 %772, %v543_v23  }
 0x11a   :  { %682 = vperm.xlu1 %773, %v536_v5  }
 0x11e   :  { %692 = vperm.xlu1 %773, %v538_v62   ;;  %v817_v62 = vld [vmem:[%s1245_s0 + $0x3c] sm:$0xf] }
 0x122   :  { %702 = vperm.xlu1 %773, %v540_v30  }
 0x126   :  { %712 = vperm.xlu1 %773, %v542_v7   ;;  %v818_v7 = vld [vmem:[%s1245_s0 + $0x20] sm:$0xf] }
 0x159   :  { %v552_v37 = vpop.permute.xlu1 %551 }
 0x15a   :  { %v547_v12 = vpop.permute.xlu0 %546  ;;  %v625_v55 = vmul.f32 %v806_v6, %v552_v37 }
 0x15b   :  { %v624_v10 = vmul.f32 %v810_v25, %v547_v12 }
 0x15d   :  { %v557_v38 = vpop.permute.xlu1 %556 }
 0x15e   :  { %v626_v61 = vmul.f32 %v812_v49, %v557_v38 }
 0x161   :  { %v562_v32 = vpop.permute.xlu1 %561 }
 0x162   :  { %v627_v57 = vmul.f32 %v807_v50, %v562_v32 }
 0x165   :  { %v567_v22 = vpop.permute.xlu1 %566  ;;  %v592_v43 = vpop.permute.xlu0 %591 }
 0x166   :  { %v633_v31 = vmul.f32 %v811_v35, %v592_v43  ;;  %v628_v51 = vmul.f32 %v814_v21, %v567_v22  ;;  %v819_v22 = vld [vmem:[%s1245_s0 + $0x28] sm:$0xf] }
 0x169   :  { %v572_v45 = vpop.permute.xlu1 %571 }
 0x16a   :  { %v602_v46 = vpop.permute.xlu0 %601  ;;  %v629_v60 = vmul.f32 %v808_v2, %v572_v45 }
 0x16b   :  { %v635_v54 = vmul.f32 %v813_v52, %v602_v46 }
 0x16d   :  { %v577_v20 = vpop.permute.xlu1 %576 }
 0x16e   :  { %v612_v15 = vpop.permute.xlu0 %611  ;;  %v630_v23 = vmul.f32 %v816_v44, %v577_v20  ;;  %v820_v20 = vld [vmem:[%s1245_s0 + $0x30] sm:$0xf] }
 0x16f   :  { %v637_v24 = vmul.f32 %v815_v19, %v612_v15 }
 0x171   :  { %v582_v47 = vpop.permute.xlu1 %581 }
 0x172   :  { %v631_v8 = vmul.f32 %v809_v1, %v582_v47 }
 0x173   :  { %v622_v48 = vpop.permute.xlu0 %621 }
 0x174   :  { %v639_v29 = vmul.f32 %v817_v62, %v622_v48 }
 0x175   :  { %v587_v53 = vpop.permute.xlu1 %586 }
 0x176   :  { %v632_v37 = vmul.f32 %v818_v7, %v587_v53  ;;  %v821_v53 = vld [vmem:[%s1245_s0 + $0x38] sm:$0xf] }
 0x177   :  { %v648_v56 = vpop.permute.xlu0 %647 }
 0x178   :  { %v721_v58 = vadd.f32 %v648_v56, %v625_v55 }
 0x179   :  { %v1188_v3 = vpop.permute.xlu1 %596 }
 0x17a   :  { %737 = vst [vmem:[#allocation2 + $0x4] sm:$0xf] %v721_v58  ;;  %v634_v43 = vmul.f32 %v819_v22, %v1188_v3 }
 0x17b   :  { %v658_v63 = vpop.permute.xlu0 %657 }
 0x17c   :  { %v723_v59 = vadd.f32 %v658_v63, %v627_v57 }
 0x17d   :  { %v1193_v0 = vpop.permute.xlu1 %606 }
 0x17e   :  { %739 = vst [vmem:[#allocation2 + $0xc] sm:$0xf] %v723_v59  ;;  %v636_v15 = vmul.f32 %v820_v20, %v1193_v0 }
 0x17f   :  { %v668_v26 = vpop.permute.xlu0 %667 }
 0x180   :  { %v725_v40 = vadd.f32 %v668_v26, %v629_v60 }
 0x181   :  { %v1198_v42 = vpop.permute.xlu1 %616 }
 0x182   :  { %741 = vst [vmem:[#allocation2 + $0x14] sm:$0xf] %v725_v40  ;;  %v638_v6 = vmul.f32 %v821_v53, %v1198_v42 }
 0x183   :  { %v678_v9 = vpop.permute.xlu0 %677 }
 0x184   :  { %v727_v34 = vadd.f32 %v678_v9, %v631_v8 }
 0x185   :  { %v643_v13 = vpop.permute.xlu1 %642 }
 0x186   :  { %v720_v14 = vadd.f32 %v643_v13, %v624_v10  ;;  %743 = vst [vmem:[#allocation2 + $0x1c] sm:$0xf] %v727_v34 }
 0x187   :  { %v688_v17 = vpop.permute.xlu0 %687 }
 0x188   :  { %736 = vst [vmem:[#allocation2] sm:$0xf] %v720_v14  ;;  %v729_v39 = vadd.f32 %v688_v17, %v633_v31 }
 0x189   :  { %v653_v18 = vpop.permute.xlu1 %652 }
 0x18a   :  { %v722_v4 = vadd.f32 %v653_v18, %v626_v61  ;;  %745 = vst [vmem:[#allocation2 + $0x24] sm:$0xf] %v729_v39 }
 0x18b   :  { %v698_v11 = vpop.permute.xlu0 %697 }
 0x18c   :  { %738 = vst [vmem:[#allocation2 + $0x8] sm:$0xf] %v722_v4  ;;  %v731_v16 = vadd.f32 %v698_v11, %v635_v54 }
 0x18d   :  { %v663_v28 = vpop.permute.xlu1 %662 }
 0x18e   :  { %v724_v36 = vadd.f32 %v663_v28, %v628_v51  ;;  %747 = vst [vmem:[#allocation2 + $0x2c] sm:$0xf] %v731_v16 }
 0x18f   :  { %v708_v27 = vpop.permute.xlu0 %707 }
 0x190   :  { %740 = vst [vmem:[#allocation2 + $0x10] sm:$0xf] %v724_v36  ;;  %v733_v5 = vadd.f32 %v708_v27, %v637_v24 }
 0x191   :  { %v673_v41 = vpop.permute.xlu1 %672 }
 0x192   :  { %v726_v30 = vadd.f32 %v673_v41, %v630_v23  ;;  %749 = vst [vmem:[#allocation2 + $0x34] sm:$0xf] %v733_v5 }
 0x193   :  { %v718_v33 = vpop.permute.xlu0 %717 }
 0x194   :  { %742 = vst [vmem:[#allocation2 + $0x18] sm:$0xf] %v726_v30  ;;  %v735_v38 = vadd.f32 %v718_v33, %v639_v29 }
 0x195   :  { %v683_v12 = vpop.permute.xlu1 %682 }
 0x196   :  { %v728_v32 = vadd.f32 %v683_v12, %v632_v37  ;;  %751 = vst [vmem:[#allocation2 + $0x3c] sm:$0xf] %v735_v38 }
 0x198   :  { %744 = vst [vmem:[#allocation2 + $0x20] sm:$0xf] %v728_v32 }
 0x199   :  { %v693_v45 = vpop.permute.xlu1 %692 }
 0x19a   :  { %v730_v46 = vadd.f32 %v693_v45, %v634_v43 }
 0x19c   :  { %746 = vst [vmem:[#allocation2 + $0x28] sm:$0xf] %v730_v46 }
 0x19d   :  { %v703_v47 = vpop.permute.xlu1 %702 }
 0x19e   :  { %v732_v48 = vadd.f32 %v703_v47, %v636_v15 }
 0x1a0   :  { %748 = vst [vmem:[#allocation2 + $0x30] sm:$0xf] %v732_v48 }
 0x1a1   :  { %v713_v55 = vpop.permute.xlu1 %712 }
 0x1a2   :  { %v734_v56 = vadd.f32 %v713_v55, %v638_v6 }
 0x1a4   :  { %750 = vst [vmem:[#allocation2 + $0x38] sm:$0xf] %v734_v56 }
 0x1a5   :  { %833 = shalt.err (!%p830_p4)
}
 0x1a6   :  { %s846_s26 = smov 64   ;;  %s847_s27 = smov 4  }
 0x1a7   :  { %763 = dma.vmem_to_hbm [thread:$0]  %s758_s22, 1024, %s1248_s3, [#allocation3], %s846_s26, %s846_s26, %s847_s27  }
 0x1a8   :  { %842 = dma.done.wait [#allocation3], 1024  }
 0x1a9   :  { %843 = vsyncadd [#allocation3], 4294966272 }
 0x1aa   :  { %767 = vsyncpa [#allocation3], 1 }

</bundles_post_ra>
